<compile_context>
chip_gen: v7x
topology: tpu7x:2x2x1
jax: 0.10.0
libtpu: 0.0.40
codegen_flags: <defaults>
</compile_context>

<pallas_src>
import functools

import jax
import jax.numpy as jnp
from jax.experimental import pallas as pl
from jax.experimental.pallas import tpu as pltpu


_L2 = 256    # fused width of the two second hidden layers (128 actor + 128 critic)
_OUT = 128   # lane-dense output slab width ([probs | value | zero padding])


def _round_up(x, m):
    return (x + m - 1) // m * m


def _ppo_fused_kernel(x_ref, w1_ref, w2_ref, w3_ref, b_ref, out_ref, *,
                      action_dim, two_h):
    """One batch tile of the fused actor+critic MLP.

    x_ref  : (TB, state_dim)  f32
    w1_ref : (state_dim, 2H)  bf16 = [w1a | w1c]
    w2_ref : (2H, 256)        bf16 = blockdiag(w2a, w2c)
    w3_ref : (256, 128)       bf16 = blockdiag(w3a, w3c), zero-padded to 128 lanes
    b_ref  : (3, max(2H,256)) f32  = packed biases (rows: b1 | b2 | b3)
    out_ref: (TB, 128)        f32  = [softmax probs | critic value | zeros]
    """
    x = x_ref[...]
    b1 = b_ref[0:1, :two_h]
    b2 = b_ref[1:2, :_L2]
    b3 = b_ref[2:3, :_OUT]

    # bf16 MXU operands, f32 accumulation.  Cast happens in-kernel (cheap VPU
    # op) so the HBM input stays f32 and no extra wrapper pass is needed.
    h1 = jnp.tanh(jnp.dot(x.astype(jnp.bfloat16), w1_ref[...],
                          preferred_element_type=jnp.float32) + b1)
    h2 = jnp.tanh(jnp.dot(h1.astype(jnp.bfloat16), w2_ref[...],
                          preferred_element_type=jnp.float32) + b2)
    z = jnp.dot(h2.astype(jnp.bfloat16), w3_ref[...],
                preferred_element_type=jnp.float32) + b3

    # lanes [0, action_dim)    -> actor logits
    # lane  action_dim         -> critic value
    # lanes (action_dim, 128)  -> exact zeros (zero weight / bias padding)
    lane = jax.lax.broadcasted_iota(jnp.int32, z.shape, 1)
    is_actor = lane < action_dim

    # Numerically stable softmax over the actor lanes only.  exp is applied to
    # the already-masked logits so the critic lane (-inf after masking) yields
    # exactly 0 and can never overflow.
    masked = jnp.where(is_actor, z, -jnp.inf)
    m = jnp.max(masked, axis=-1, keepdims=True)
    e = jnp.exp(masked - m)
    denom = jnp.sum(e, axis=-1, keepdims=True)
    # EUP approx reciprocal (idle slot) + one Newton step keeps ~1e-7 relative.
    r = pl.reciprocal(denom, approx=True)
    r = r * (2.0 - denom * r)
    probs = e * r

    # Single unmasked, lane-dense store: probs | value | zeros.
    out_ref[...] = jnp.where(is_actor, probs, z)


def ppo_forward(state, packed, action_dim, *, tile_b=2048):
    """Fused actor probs + critic value.

    state : (B, state_dim) float32
    packed: dict with pre-fused weights W1 (S,2H), W2 (2H,256), W3 (256,128) in
            bf16 and B (3, max(2H,256)) f32, produced by pack_params().
    returns: probs (B, action_dim), value (B, 1)
    """
    B, state_dim = state.shape
    w1, w2, w3, bias = packed["W1"], packed["W2"], packed["W3"], packed["B"]
    two_h = w1.shape[1]

    # Batch tiling: no wrapper-side padding.  Small batches run as one
    # full-extent block; large batches use big (sublane-aligned) tiles but keep
    # >=4 grid steps so double-buffering / v7x megacore have work to split.
    if B <= 512:
        tb = B                      # full-extent block (always a legal shape)
    else:
        tb = min(_round_up(tile_b, 8), max(512, _round_up(pl.cdiv(B, 4), 8)))
    grid = (pl.cdiv(B, tb),)

    flops = 2 * B * (state_dim * two_h + two_h * _L2 + _L2 * _OUT)
    transcendentals = B * (two_h + _L2 + action_dim)      # tanh, tanh, exp
    bytes_accessed = (4 * B * state_dim                     # state in (f32)
                      + 2 * (state_dim * two_h + two_h * _L2 + _L2 * _OUT)  # bf16 weights
                      + 4 * int(bias.size)                  # biases (f32)
                      + 4 * B * _OUT)                       # output slab (f32)

    out = pl.pallas_call(
        functools.partial(_ppo_fused_kernel, action_dim=action_dim, two_h=two_h),
        out_shape=jax.ShapeDtypeStruct((B, _OUT), jnp.float32),
        grid=grid,
        in_specs=[
            pl.BlockSpec((tb, state_dim), lambda i: (i, 0)),        # state tile
            pl.BlockSpec((state_dim, two_h), lambda i: (0, 0)),     # W1 (resident)
            pl.BlockSpec((two_h, _L2), lambda i: (0, 0)),           # W2 (resident)
            pl.BlockSpec((_L2, _OUT), lambda i: (0, 0)),            # W3 (resident)
            pl.BlockSpec(bias.shape, lambda i: (0, 0)),             # packed biases
        ],
        out_specs=pl.BlockSpec((tb, _OUT), lambda i: (i, 0)),
        compiler_params=pltpu.CompilerParams(
            dimension_semantics=("parallel",)),
        cost_estimate=pl.CostEstimate(
            flops=flops, transcendentals=transcendentals,
            bytes_accessed=bytes_accessed),
    )(state, w1, w2, w3, bias)

    probs = out[:, :action_dim]
    value = out[:, action_dim:action_dim + 1]
    return probs, value


def init_params(key, state_dim, hidden, action_dim):
    """PyTorch-Linear-style init: U(-1/sqrt(fan_in), 1/sqrt(fan_in))."""
    def linear(k, fan_in, fan_out):
        kw, kb = jax.random.split(k)
        bound = 1.0 / jnp.sqrt(fan_in)
        w = jax.random.uniform(kw, (fan_in, fan_out), jnp.float32, -bound, bound)
        b = jax.random.uniform(kb, (1, fan_out), jnp.float32, -bound, bound)
        return w, b

    keys = jax.random.split(key, 6)
    w1a, b1a = linear(keys[0], state_dim, hidden)
    w2a, b2a = linear(keys[1], hidden, 128)
    w3a, b3a = linear(keys[2], 128, action_dim)
    w1c, b1c = linear(keys[3], state_dim, hidden)
    w2c, b2c = linear(keys[4], hidden, 128)
    w3c, b3c = linear(keys[5], 128, 1)
    return dict(w1a=w1a, b1a=b1a, w2a=w2a, b2a=b2a, w3a=w3a, b3a=b3a,
                w1c=w1c, b1c=b1c, w2c=w2c, b2c=b2c, w3c=w3c, b3c=b3c)


def pack_params(p, action_dim):
    """One-time host-side fusion of the 12 actor/critic tensors into 4 slabs.

    Weights are stored bf16 (MXU-native on v5e/v6e/v7x); accumulation stays
    f32 in-kernel.  Biases stay f32 (added after the f32 accumulation).
    """
    hidden = p["w1a"].shape[1]
    two_h = 2 * hidden
    assert action_dim + 1 <= _OUT, "action_dim+1 must fit in one 128-lane slab"

    # Layer 1: concat along output lanes.
    W1 = jnp.concatenate([p["w1a"], p["w1c"]], axis=1)                 # (S, 2H)
    # Layer 2: block diagonal (zeros are tiny, negligible).
    W2 = jnp.zeros((two_h, _L2), jnp.float32)
    W2 = W2.at[:hidden, :128].set(p["w2a"])
    W2 = W2.at[hidden:, 128:].set(p["w2c"])
    # Layer 3: block diagonal packed into a lane-dense 128-wide slab.
    W3 = jnp.zeros((_L2, _OUT), jnp.float32)
    W3 = W3.at[:128, :action_dim].set(p["w3a"])
    W3 = W3.at[128:, action_dim:action_dim + 1].set(p["w3c"])
    # Biases packed into one small slab (rows: b1 | b2 | b3).
    bw = max(two_h, _L2, _OUT)
    Bp = jnp.zeros((3, bw), jnp.float32)
    Bp = Bp.at[0, :two_h].set(jnp.concatenate([p["b1a"], p["b1c"]], axis=1)[0])
    Bp = Bp.at[1, :_L2].set(jnp.concatenate([p["b2a"], p["b2c"]], axis=1)[0])
    Bp = Bp.at[2, :action_dim].set(p["b3a"][0])
    Bp = Bp.at[2, action_dim].set(p["b3c"][0, 0])
    return dict(W1=W1.astype(jnp.bfloat16),
                W2=W2.astype(jnp.bfloat16),
                W3=W3.astype(jnp.bfloat16),
                B=Bp)


def _reference(state, p):
    """Pure-JAX f32 reference of the PyTorch module's forward semantics."""
    h = jnp.tanh(state @ p["w1a"] + p["b1a"])
    h = jnp.tanh(h @ p["w2a"] + p["b2a"])
    probs = jax.nn.softmax(h @ p["w3a"] + p["b3a"], axis=-1)
    hc = jnp.tanh(state @ p["w1c"] + p["b1c"])
    hc = jnp.tanh(hc @ p["w2c"] + p["b2c"])
    value = hc @ p["w3c"] + p["b3c"]
    return probs, value


if __name__ == "__main__":
    key = jax.random.PRNGKey(0)
    k_state, k_params, k_big = jax.random.split(key, 3)

    state_dim, hidden, action_dim = 32, 64, 8
    params = init_params(k_params, state_dim, hidden, action_dim)
    packed = pack_params(params, action_dim)

    # Small case: single full-extent block.
    B = 8
    state = jax.random.normal(k_state, (B, state_dim), jnp.float32)
    probs, value = ppo_forward(state, packed, action_dim)
    jax.block_until_ready((probs, value))

    ref_probs, ref_value = _reference(state, params)
    assert probs.shape == (B, action_dim) and value.shape == (B, 1)
    # bf16 MXU operands -> tolerances loosened vs. the f32 reference.
    assert jnp.allclose(probs, ref_probs, atol=3e-2, rtol=3e-2)
    assert jnp.allclose(value, ref_value, atol=3e-2, rtol=3e-2)
    # Softmax normalization itself is done in f32 in-kernel -> tight.
    assert jnp.allclose(jnp.sum(probs, axis=-1), 1.0, atol=1e-5)

    # Larger case: exercises the multi-step grid and the partial last block
    # (no wrapper-side padding copy).
    B2 = 600
    state2 = jax.random.normal(k_big, (B2, state_dim), jnp.float32)
    probs2, value2 = ppo_forward(state2, packed, action_dim, tile_b=512)
    jax.block_until_ready((probs2, value2))
    ref_probs2, ref_value2 = _reference(state2, params)
    assert probs2.shape == (B2, action_dim) and value2.shape == (B2, 1)
    assert jnp.allclose(probs2, ref_probs2, atol=3e-2, rtol=3e-2)
    assert jnp.allclose(value2, ref_value2, atol=3e-2, rtol=3e-2)
    assert jnp.allclose(jnp.sum(probs2, axis=-1), 1.0, atol=1e-5)

    # TODO(synk): Categorical sampling / log_prob / entropy (act/evaluate) are
    # host-side glue over `probs` and are not part of the TPU hot path.
    print("KERNEL_OK")
</pallas_src>

<mosaic_0001>
module attributes {stable_mosaic.version = 11 : i64} {
  func.func @_ppo_fused_kernel(%arg0: i32, %arg1: memref<8x32xf32, #tpu.memory_space<vmem>>, %arg2: memref<32x128xbf16, #tpu.memory_space<vmem>>, %arg3: memref<128x256xbf16, #tpu.memory_space<vmem>>, %arg4: memref<256x128xbf16, #tpu.memory_space<vmem>>, %arg5: memref<3x256xf32, #tpu.memory_space<vmem>>, %arg6: memref<8x128xf32, #tpu.memory_space<vmem>>) attributes {dimension_semantics = [#tpu.dimension_semantics<parallel>], iteration_bounds = array<i64: 1>, scalar_prefetch = 0 : i64, scratch_operands = 0 : i64, tpu.core_type = #tpu.core_type<tc>, window_params = [{transform_indices = @transform_0, window_bounds = array<i64: 8, 32>}, {pipeline_mode = #tpu.pipeline_mode<synchronous>, transform_indices = @transform_1, window_bounds = array<i64: 32, 128>}, {pipeline_mode = #tpu.pipeline_mode<synchronous>, transform_indices = @transform_2, window_bounds = array<i64: 128, 256>}, {pipeline_mode = #tpu.pipeline_mode<synchronous>, transform_indices = @transform_3, window_bounds = array<i64: 256, 128>}, {pipeline_mode = #tpu.pipeline_mode<synchronous>, transform_indices = @transform_4, window_bounds = array<i64: 3, 256>}, {transform_indices = @transform_5, window_bounds = array<i64: 8, 128>}]} {
    %c0 = arith.constant 0 : index
    %c0_0 = arith.constant 0 : index
    %0 = vector.load %arg1[%c0, %c0_0] : memref<8x32xf32, #tpu.memory_space<vmem>>, vector<8x32xf32>
    %c0_1 = arith.constant 0 : index
    %c0_2 = arith.constant 0 : index
    %1 = vector.load %arg5[%c0_1, %c0_2] : memref<3x256xf32, #tpu.memory_space<vmem>>, vector<1x128xf32>
    %c1 = arith.constant 1 : index
    %c0_3 = arith.constant 0 : index
    %2 = vector.load %arg5[%c1, %c0_3] : memref<3x256xf32, #tpu.memory_space<vmem>>, vector<1x256xf32>
    %c2 = arith.constant 2 : index
    %c0_4 = arith.constant 0 : index
    %3 = vector.load %arg5[%c2, %c0_4] : memref<3x256xf32, #tpu.memory_space<vmem>>, vector<1x128xf32>
    %4 = arith.truncf %0 : vector<8x32xf32> to vector<8x32xbf16>
    %c0_5 = arith.constant 0 : index
    %c0_6 = arith.constant 0 : index
    %5 = vector.load %arg2[%c0_5, %c0_6] : memref<32x128xbf16, #tpu.memory_space<vmem>>, vector<32x128xbf16>
    %cst = arith.constant dense<0.000000e+00> : vector<8x128xf32>
    %6 = tpu.matmul %4, %5, %cst {dimension_numbers = #tpu.dot_dimension_numbers<[1], [0], [0], [1], [0, 0, 1, 1], [], []>} : vector<8x32xbf16>, vector<32x128xbf16>, vector<8x128xf32> -> vector<8x128xf32>
    %7 = vector.broadcast %1 : vector<1x128xf32> to vector<8x128xf32>
    %8 = arith.addf %6, %7 : vector<8x128xf32>
    %9 = math.tanh %8 : vector<8x128xf32>
    %10 = arith.truncf %9 : vector<8x128xf32> to vector<8x128xbf16>
    %c0_7 = arith.constant 0 : index
    %c0_8 = arith.constant 0 : index
    %11 = vector.load %arg3[%c0_7, %c0_8] : memref<128x256xbf16, #tpu.memory_space<vmem>>, vector<128x256xbf16>
    %cst_9 = arith.constant dense<0.000000e+00> : vector<8x256xf32>
    %12 = tpu.matmul %10, %11, %cst_9 {dimension_numbers = #tpu.dot_dimension_numbers<[1], [0], [0], [1], [0, 0, 1, 1], [], []>} : vector<8x128xbf16>, vector<128x256xbf16>, vector<8x256xf32> -> vector<8x256xf32>
    %13 = vector.broadcast %2 : vector<1x256xf32> to vector<8x256xf32>
    %14 = arith.addf %12, %13 : vector<8x256xf32>
    %15 = math.tanh %14 : vector<8x256xf32>
    %16 = arith.truncf %15 : vector<8x256xf32> to vector<8x256xbf16>
    %c0_10 = arith.constant 0 : index
    %c0_11 = arith.constant 0 : index
    %17 = vector.load %arg4[%c0_10, %c0_11] : memref<256x128xbf16, #tpu.memory_space<vmem>>, vector<256x128xbf16>
    %cst_12 = arith.constant dense<0.000000e+00> : vector<8x128xf32>
    %18 = tpu.matmul %16, %17, %cst_12 {dimension_numbers = #tpu.dot_dimension_numbers<[1], [0], [0], [1], [0, 0, 1, 1], [], []>} : vector<8x256xbf16>, vector<256x128xbf16>, vector<8x128xf32> -> vector<8x128xf32>
    %19 = vector.broadcast %3 : vector<1x128xf32> to vector<8x128xf32>
    %20 = arith.addf %18, %19 : vector<8x128xf32>
    %21 = tpu.iota {dimensions = array<i32: 1>} : vector<8x128xi32>
    %c8_i32 = arith.constant 8 : i32
    %22 = vector.broadcast %c8_i32 : i32 to vector<8x128xi32>
    %23 = arith.cmpi slt, %21, %22 : vector<8x128xi32>
    %cst_13 = arith.constant 0xFF800000 : f32
    %24 = vector.broadcast %cst_13 : f32 to vector<8x128xf32>
    %25 = arith.select %23, %20, %24 : vector<8x128xi1>, vector<8x128xf32>
    %cst_14 = arith.constant dense<0xFF800000> : vector<8xf32>
    %26 = vector.multi_reduction <maximumf>, %25, %cst_14 [1] : vector<8x128xf32> to vector<8xf32>
    %27 = vector.shape_cast %26 : vector<8xf32> to vector<8x1xf32>
    %28 = vector.broadcast %27 : vector<8x1xf32> to vector<8x128xf32>
    %29 = arith.subf %25, %28 : vector<8x128xf32>
    %30 = math.exp %29 : vector<8x128xf32>
    %cst_15 = arith.constant dense<0.000000e+00> : vector<8xf32>
    %31 = vector.multi_reduction <add>, %30, %cst_15 [1] : vector<8x128xf32> to vector<8xf32>
    %32 = vector.shape_cast %31 : vector<8xf32> to vector<8x1xf32>
    %33 = tpu.reciprocal %32 {approx = true} : vector<8x1xf32> -> vector<8x1xf32>
    %34 = arith.mulf %32, %33 : vector<8x1xf32>
    %cst_16 = arith.constant 2.000000e+00 : f32
    %35 = vector.broadcast %cst_16 : f32 to vector<8x1xf32>
    %36 = arith.subf %35, %34 : vector<8x1xf32>
    %37 = arith.mulf %33, %36 : vector<8x1xf32>
    %38 = vector.broadcast %37 : vector<8x1xf32> to vector<8x128xf32>
    %39 = arith.mulf %30, %38 : vector<8x128xf32>
    %40 = arith.select %23, %39, %20 : vector<8x128xi1>, vector<8x128xf32>
    %c0_17 = arith.constant 0 : index
    %c0_18 = arith.constant 0 : index
    %41 = vector.load %arg6[%c0_17, %c0_18] : memref<8x128xf32, #tpu.memory_space<vmem>>, vector<8x128xf32>
    tpu.vector_store %arg6[%c0_17, %c0_18], %40 {strides = array<i32>} : memref<8x128xf32, #tpu.memory_space<vmem>>, vector<8x128xf32>,
    return
  }
  func.func @transform_0(%arg0: i32) -> (i32, i32) {
    %c0_i32 = arith.constant 0 : i32
    %c0_i32_0 = arith.constant 0 : i32
    return %arg0, %c0_i32 : i32, i32
  }
  func.func @transform_1(%arg0: i32) -> (i32, i32) {
    %c0_i32 = arith.constant 0 : i32
    %c0_i32_0 = arith.constant 0 : i32
    %c0_i32_1 = arith.constant 0 : i32
    return %c0_i32, %c0_i32_0 : i32, i32
  }
  func.func @transform_2(%arg0: i32) -> (i32, i32) {
    %c0_i32 = arith.constant 0 : i32
    %c0_i32_0 = arith.constant 0 : i32
    %c0_i32_1 = arith.constant 0 : i32
    return %c0_i32, %c0_i32_0 : i32, i32
  }
  func.func @transform_3(%arg0: i32) -> (i32, i32) {
    %c0_i32 = arith.constant 0 : i32
    %c0_i32_0 = arith.constant 0 : i32
    %c0_i32_1 = arith.constant 0 : i32
    return %c0_i32, %c0_i32_0 : i32, i32
  }
  func.func @transform_4(%arg0: i32) -> (i32, i32) {
    %c0_i32 = arith.constant 0 : i32
    %c0_i32_0 = arith.constant 0 : i32
    %c0_i32_1 = arith.constant 0 : i32
    return %c0_i32, %c0_i32_0 : i32, i32
  }
  func.func @transform_5(%arg0: i32) -> (i32, i32) {
    %c0_i32 = arith.constant 0 : i32
    %c0_i32_0 = arith.constant 0 : i32
    return %arg0, %c0_i32 : i32, i32
  }
}

</mosaic_0001>

<bundles_post_ra>
// kernel: tpu_custom_call.1
= control target key start
LH: loop header
LB: loop body
LE: loop exit
PB: predicated region body
PF: predicated region fallthrough
CT: control target
= control target key end

     0   :  { %10 = vsyncpa [#allocation3], 0  ;;  %s878_s0 = inlined_call_operand.hbm [shape: f32[8,32], index: 0, kind: input, shape index: {}]   ;;  %s879_s1 = inlined_call_operand.hbm [shape: bf16[32,128], index: 1, kind: input, shape index: {}]   ;;  %s880_s2 = inlined_call_operand.hbm [shape: bf16[128,256], index: 2, kind: input, shape index: {}]   ;;  %s881_s3 = inlined_call_operand.hbm [shape: bf16[256,128], index: 3, kind: input, shape index: {}]   ;;  %s882_s4 = inlined_call_operand.vmem [shape: f32[3,256], index: 4, kind: input, shape index: {}]   ;;  %s883_s5 = inlined_call_operand.hbm [shape: f32[8,128], index: 5, kind: output, shape index: {}]  }
   0x1   :  { %11 = vsyncpa [#allocation6], 0 }
   0x2   :  { %12 = vsyncpa [#allocation9], 0 }
   0x3   :  { %13 = vsyncpa [#allocation4], 0  ;;  %s759_s18 = smov [#allocation5]   ;;  %s641_s22 = scalar_lea.hbm %s879_s1, 256 }
   0x4   :  { %s29_s19 = sshll.u32 %s759_s18, 4  ;;  %p642_p0 = scmp.ne.s32.totalorder %s879_s1, %s641_s22  ;;  %s30_s19 = int_to_ptr.vmem [resolvable:$true] %s29_s19 }
   0x5   :  { %p645_p1 = scmp.lt.u32.totalorder %s641_s22, %s879_s1 }
   0x7   :  { %p647_p2 = pnand %p645_p1, %p642_p0 }
   0x9   :  { %650 = shalt.err (!%p647_p2)
}
   0xa   :  { %s651_s27 = scalar_lea.vmem %s30_s19, 256  ;;  %p656_p4 = scmp.lt.s32.totalorder %s30_s19, %s30_s19 }
   0xb   :  { %p652_p3 = scmp.ne.s32.totalorder %s30_s19, %s651_s27  ;;  %p657_p5 = scmp.lt.s32.totalorder %s651_s27, %s651_s27 }
   0xd   :  { %p658_p6 = por %p657_p5, %p656_p4 }
   0xf   :  { %p659_p7 = pnand %p658_p6, %p652_p3 }
  0x11   :  { %662 = shalt.err (!%p659_p7)
}
  0x12   :  { %s760_s28 = smov 64   ;;  %s761_s29 = smov 4  }
  0x13   :  { %35 = dma.hbm_to_vmem [thread:$0]  %s879_s1, 256, %s30_s19, [#allocation6], %s760_s28, %s760_s28, %s761_s29  }
  0x14   :  { %s762_s7 = smov [#allocation2]   ;;  %s763_s9 = smov [#allocation7]  }
  0x15   :  { %s20_s8 = sshll.u32 %s762_s7, 4  ;;  %s41_s10 = sshll.u32 %s763_s9, 4  ;;  %s21_s8 = int_to_ptr.vmem [resolvable:$true] %s20_s8  ;;  %s42_s10 = int_to_ptr.vmem [resolvable:$true] %s41_s10 }
  0x16   :  { %s663_s13 = scalar_lea.hbm %s878_s0, 128 }
  0x17   :  { %p664_p8 = scmp.ne.s32.totalorder %s878_s0, %s663_s13  ;;  %p667_p9 = scmp.lt.u32.totalorder %s663_s13, %s878_s0 }
  0x19   :  { %p669_p10 = pnand %p667_p9, %p664_p8 }
  0x1b   :  { %672 = shalt.err (!%p669_p10)
}
  0x1c   :  { %s673_s1 = scalar_lea.vmem %s21_s8, 128  ;;  %p678_p12 = scmp.lt.s32.totalorder %s21_s8, %s21_s8 }
  0x1d   :  { %p674_p11 = scmp.ne.s32.totalorder %s21_s8, %s673_s1  ;;  %p679_p13 = scmp.lt.s32.totalorder %s673_s1, %s673_s1 }
  0x1f   :  { %p680_p0 = por %p679_p13, %p678_p12 }
  0x21   :  { %p681_p1 = pnand %p680_p0, %p674_p11 }
  0x23   :  { %684 = shalt.err (!%p681_p1)
}
  0x24   :  { %23 = dma.hbm_to_vmem [thread:$0]  %s878_s0, 128, %s21_s8, [#allocation3]  }
  0x25   :  { %s685_s22 = scalar_lea.hbm %s880_s2, 2048 }
  0x26   :  { %p686_p2 = scmp.ne.s32.totalorder %s880_s2, %s685_s22  ;;  %p689_p3 = scmp.lt.u32.totalorder %s685_s22, %s880_s2 }
  0x28   :  { %p691_p4 = pnand %p689_p3, %p686_p2 }
  0x2a   :  { %694 = shalt.err (!%p691_p4)
}
  0x2b   :  { %s695_s27 = scalar_lea.vmem %s42_s10, 2048  ;;  %p700_p6 = scmp.lt.s32.totalorder %s42_s10, %s42_s10 }
  0x2c   :  { %p696_p5 = scmp.ne.s32.totalorder %s42_s10, %s695_s27  ;;  %p701_p7 = scmp.lt.s32.totalorder %s695_s27, %s695_s27 }
  0x2e   :  { %p702_p8 = por %p701_p7, %p700_p6 }
  0x30   :  { %p703_p9 = pnand %p702_p8, %p696_p5 }
  0x32   :  { %706 = shalt.err (!%p703_p9)
}
  0x33   :  { %s764_s0 = smov 128   ;;  %s765_s30 = smov 8  }
  0x34   :  { %47 = dma.hbm_to_vmem [thread:$0]  %s880_s2, 2048, %s42_s10, [#allocation6], %s764_s0, %s764_s0, %s765_s30  }
  0x35   :  { %s766_s8 = smov [#allocation8]   ;;  %s707_s13 = scalar_lea.hbm %s881_s3, 2048 }
  0x36   :  { %s53_s9 = sshll.u32 %s766_s8, 4  ;;  %p708_p10 = scmp.ne.s32.totalorder %s881_s3, %s707_s13  ;;  %s54_s9 = int_to_ptr.vmem [resolvable:$true] %s53_s9 }
  0x37   :  { %p711_p11 = scmp.lt.u32.totalorder %s707_s13, %s881_s3 }
  0x39   :  { %p713_p12 = pnand %p711_p11, %p708_p10 }
  0x3b   :  { %716 = shalt.err (!%p713_p12)
}
  0x3c   :  { %s717_s1 = scalar_lea.vmem %s54_s9, 2048  ;;  %p722_p0 = scmp.lt.s32.totalorder %s54_s9, %s54_s9 }
  0x3d   :  { %p718_p13 = scmp.ne.s32.totalorder %s54_s9, %s717_s1  ;;  %p723_p1 = scmp.lt.s32.totalorder %s717_s1, %s717_s1 }
  0x3f   :  { %p724_p2 = por %p723_p1, %p722_p0 }
  0x41   :  { %p725_p3 = pnand %p724_p2, %p718_p13 }
  0x43   :  { %728 = shalt.err (!%p725_p3)
}
  0x44   :  { %59 = dma.hbm_to_vmem [thread:$0]  %s881_s3, 2048, %s54_s9, [#allocation9], %s760_s28, %s760_s28, %s761_s29  }
  0x45   :  { %751 = dma.done.wait [#allocation3], 128  }
  0x46   :  { %752 = vsyncadd [#allocation3], 4294967168 }
  0x47   :  { %753 = dma.done.wait [#allocation6], 2304  }
  0x48   :  { %754 = vsyncadd [#allocation6], 4294964992 }
  0x49   :  { %755 = dma.done.wait [#allocation9], 2048  }
  0x4a   :  { %756 = vsyncadd [#allocation9], 4294965248  ;;  %v767_v0 = vmov 0.0   ;;  %vm768_vm0 = vmmov 0   ;;  %v589_v1 = vld [vmem:[#allocation5] sm:$0xff]   ;;  %v590_v2 = vld [vmem:[#allocation5 + $0x8] sm:$0xff]   ;;  %v164_v46 = vlaneseq }
  0x4b   :  { %569 = vmatprep.subr.bf16.mxu0 %v767_v0  ;;  %573 = vmatprep.mubr.msk.bf16.mxu0 %vm768_vm0, %v767_v0  ;;  %v75_v3 = vld [vmem:[#allocation2] sm:$0xff]  ;;  %v594_v6 = vld [vmem:[#allocation7 + $0x14] ss:$8 sps:$4 sm:$0xff]   ;;  %vm101_vm1 = vcmask 261120   ;;  %v596_v8 = vld [vmem:[#allocation7 + $0x10] ss:$8 sps:$4 sm:$0xff]  }
  0x4c   :  { %570 = vmatpush3.bf16.msra.mxu0 %v589_v1  ;;  %v591_v4 = vld [vmem:[#allocation7 + $0x4] ss:$8 sps:$4 sm:$0xff]   ;;  %v593_v5 = vld [vmem:[#allocation7] ss:$8 sps:$4 sm:$0xff]   ;;  %v80_v7 = vpack.c.bf16 %v75_v3, %v75_v3  ;;  %v600_v11 = vld [vmem:[#allocation7 + $0x34] ss:$8 sps:$4 sm:$0xff]  }
  0x4d   :  { %571 = vmatprep.subr.bf16.mxu0 %v767_v0  ;;  %254 = vmatprep.subr.bf16.mxu1 %v591_v4  ;;  %v597_v9 = vld [vmem:[#allocation7 + $0x24] ss:$8 sps:$4 sm:$0xff]   ;;  %v599_v10 = vld [vmem:[#allocation7 + $0x20] ss:$8 sps:$4 sm:$0xff]   ;;  %v602_v12 = vld [vmem:[#allocation7 + $0x30] ss:$8 sps:$4 sm:$0xff]  }
  0x4e   :  { %255 = vmatpush1.bf16.msra.mxu1 %v593_v5  ;;  %v603_v13 = vld [vmem:[#allocation7 + $0x44] ss:$8 sps:$4 sm:$0xff]   ;;  %v605_v14 = vld [vmem:[#allocation7 + $0x40] ss:$8 sps:$4 sm:$0xff]   ;;  %v606_v15 = vld [vmem:[#allocation7 + $0x54] ss:$8 sps:$4 sm:$0xff]  }
  0x4f   :  { %256 = vmatprep.subr.bf16.mxu1 %v594_v6  ;;  %v608_v16 = vld [vmem:[#allocation7 + $0x50] ss:$8 sps:$4 sm:$0xff]   ;;  %v609_v17 = vld [vmem:[#allocation7 + $0x64] ss:$8 sps:$4 sm:$0xff]   ;;  %v611_v18 = vld [vmem:[#allocation7 + $0x60] ss:$8 sps:$4 sm:$0xff]  }
  0x50   :  { %572 = vmatpush3.bf16.msra.mxu0 %v590_v2  ;;  %v612_v19 = vld [vmem:[#allocation7 + $0x74] ss:$8 sps:$4 sm:$0xff]   ;;  %v614_v20 = vld [vmem:[#allocation7 + $0x70] ss:$8 sps:$4 sm:$0xff]   ;;  %v769_v21 = vmov 0   ;;  %v615_v22 = vld [vmem:[#allocation8 + $0x40] sm:$0xff]  }
  0x51   :  { %286 = vmatprep.mubr.bf16.mxu1 %v769_v21  ;;  %v616_v23 = vld [vmem:[#allocation8] sm:$0xff]   ;;  %v617_v24 = vld [vmem:[#allocation8 + $0x48] sm:$0xff]   ;;  %547 = vmatprep.subr.bf16.mxu0 %v615_v22  ;;  %v619_v26 = vld [vmem:[#allocation8 + $0x50] sm:$0xff]   ;;  %v165_v47 = vshrl.u32 %v164_v46, 7  ;;  %v472_v63 = vand.u32 127, %v164_v46 }
  0x52   :  { %257 = vmatpush1.bf16.msra.mxu1 %v596_v8  ;;  %v618_v25 = vld [vmem:[#allocation8 + $0x8] sm:$0xff]   ;;  %v620_v27 = vld [vmem:[#allocation8 + $0x10] sm:$0xff]   ;;  %v621_v28 = vld [vmem:[#allocation8 + $0x58] sm:$0xff]  }
  0x53   :  { %574 = vmatmul.mubr.msk.bf16.vlgmr.msra.gmra.mrb[0].mxu0 %vm101_vm1, %v80_v7  ;;  %258 = vmatprep.subr.bf16.mxu1 %v597_v9  ;;  %v622_v29 = vld [vmem:[#allocation8 + $0x18] sm:$0xff]   ;;  %v507_v30 = vld [vmem:[%s882_s4] ss:$0 sm:$0xff]  ;;  %v623_v38 = vld [vmem:[#allocation8 + $0x60] sm:$0xff]   ;;  %v166_v48 = vsub.s32 0, %v165_v47  ;;  %v170_v50 = vsub.s32 1, %v165_v47 }
  0x54   :  { %548 = vmatpush3.bf16.msra.mxu0 %v616_v23  ;;  %v624_v39 = vld [vmem:[#allocation8 + $0x20] sm:$0xff]   ;;  %v625_v40 = vld [vmem:[#allocation8 + $0x68] sm:$0xff]   ;;  %v627_v42 = vld [vmem:[#allocation8 + $0x70] sm:$0xff]   ;;  %vm473_vm2 = vcmp.lt.s32.totalorder %v472_v63, 8 }
  0x55   :  { %549 = vmatprep.subr.bf16.mxu0 %v617_v24  ;;  %v626_v41 = vld [vmem:[#allocation8 + $0x28] sm:$0xff]   ;;  %v628_v43 = vld [vmem:[#allocation8 + $0x30] sm:$0xff]   ;;  %v629_v44 = vld [vmem:[#allocation8 + $0x78] sm:$0xff]  }
  0x56   :  { %259 = vmatpush1.bf16.msra.mxu1 %v599_v10  ;;  %v630_v45 = vld [vmem:[#allocation8 + $0x38] sm:$0xff]   ;;  %v506_v49 = vld [vmem:[%s882_s4 + $0x1] ss:$4 sm:$0x3]  ;;  %v527_v2 = vld [vmem:[%s882_s4 + $0x2] ss:$0 sm:$0xff] }
  0x57   :  { %260 = vmatprep.subr.bf16.mxu1 %v600_v11  ;;  %v167_v51 = vrot.slane %v506_v49, %v166_v48  ;;  %v171_v52 = vrot.slane %v506_v49, %v170_v50  ;;  %s770_s4 = smov [#allocation10]  }
  0x58   :  { %550 = vmatpush3.bf16.msra.mxu0 %v618_v25  ;;  %s495_s21 = sshll.u32 %s770_s4, 4  ;;  %s496_s21 = int_to_ptr.vmem [resolvable:$true] %s495_s21 }
  0x59   :  { %551 = vmatprep.subr.bf16.mxu0 %v619_v26  ;;  %s729_s22 = scalar_lea.vmem %s496_s21, 128  ;;  %p734_p5 = scmp.lt.s32.totalorder %s496_s21, %s496_s21 }
  0x5a   :  { %261 = vmatpush1.bf16.msra.mxu1 %v602_v12  ;;  %p730_p4 = scmp.ne.s32.totalorder %s496_s21, %s729_s22  ;;  %p735_p6 = scmp.lt.s32.totalorder %s729_s22, %s729_s22 }
  0x5b   :  { %262 = vmatprep.subr.bf16.mxu1 %v603_v13 }
  0x5c   :  { %552 = vmatpush3.bf16.msra.mxu0 %v620_v27  ;;  %p736_p7 = por %p735_p6, %p734_p5 }
  0x5d   :  { %553 = vmatprep.subr.bf16.mxu0 %v621_v28 }
  0x5e   :  { %263 = vmatpush1.bf16.msra.mxu1 %v605_v14  ;;  %p737_p8 = pnand %p736_p7, %p730_p4 }
  0x5f   :  { %264 = vmatprep.subr.bf16.mxu1 %v606_v15 }
  0x60   :  { %554 = vmatpush3.bf16.msra.mxu0 %v622_v29 }
  0x61   :  { %555 = vmatprep.subr.bf16.mxu0 %v623_v38 }
  0x62   :  { %265 = vmatpush1.bf16.msra.mxu1 %v608_v16 }
  0x63   :  { %266 = vmatprep.subr.bf16.mxu1 %v609_v17 }
  0x64   :  { %556 = vmatpush3.bf16.msra.mxu0 %v624_v39 }
  0x65   :  { %557 = vmatprep.subr.bf16.mxu0 %v625_v40 }
  0x66   :  { %267 = vmatpush1.bf16.msra.mxu1 %v611_v18 }
  0x67   :  { %268 = vmatprep.subr.bf16.mxu1 %v612_v19 }
  0x68   :  { %558 = vmatpush3.bf16.msra.mxu0 %v626_v41 }
  0x69   :  { %559 = vmatprep.subr.bf16.mxu0 %v627_v42 }
  0x6a   :  { %269 = vmatpush1.bf16.msra.mxu1 %v614_v20 }
  0x6c   :  { %560 = vmatpush3.bf16.msra.mxu0 %v628_v43 }
  0x6d   :  { %561 = vmatprep.subr.bf16.mxu0 %v629_v44 }
  0x70   :  { %562 = vmatpush3.bf16.msra.mxu0 %v630_v45 }
 0x126   :  { %v139_v31 = vpop.f32.mrb[0].mxu0 }
 0x127   :  { %v140_v32 = vadd.f32 %v507_v30, %v139_v31  ;;  %v575_v33 = vpop.f32.mrb[1].mxu0 }
 0x128   :  { %v142_v34 = vpop.f32.mrb[2].mxu0 }
 0x129   :  { %631 = vtanh.f32 %v140_v32  ;;  %v576_v35 = vpop.f32.mrb[3].mxu0 }
 0x133   :  { %v632_v36 = vpop.eup %631 }
 0x134   :  { %v146_v37 = vpack.c.bf16 %v632_v36, %v632_v36 }
 0x136   :  { %287 = vmatmul.mubr.bf16.vlgmr.msra.gmra.mrb[0].mxu1 %v146_v37 }
 0x209   :  { %v288_v53 = vpop.f32.mrb[0].mxu1 }
 0x20a   :  { %v289_v54 = vadd.f32 %v288_v53, %v167_v51  ;;  %v290_v55 = vpop.f32.mrb[1].mxu1 }
 0x20b   :  { %v291_v56 = vadd.f32 %v290_v55, %v171_v52  ;;  %v292_v57 = vpop.f32.mrb[2].mxu1 }
 0x20c   :  { %633 = vtanh.f32 %v289_v54  ;;  %v293_v58 = vpop.f32.mrb[3].mxu1 }
 0x20d   :  { %635 = vtanh.f32 %v291_v56 }
 0x216   :  { %v634_v59 = vpop.eup %633 }
 0x217   :  { %v636_v60 = vpop.eup %635  ;;  %v297_v62 = vpack.c.bf16 %v634_v59, %v634_v59 }
 0x218   :  { %v298_v61 = vpack.c.bf16 %v636_v60, %v636_v60 }
 0x21a   :  { %463 = vmatprep.mubr.bf16.mxu0 %v298_v61 }
 0x21b   :  { %464 = vmatmul.mubr.bf16.vlgmr.msra.gmra.mrb[4].mxu0 %v297_v62 }
 0x2ee   :  { %v563_v0 = vpop.f32.mrb[4].mxu0 }
 0x2ef   :  { %v564_v1 = vpop.f32.mrb[5].mxu0 }
 0x2f0   :  { %v565_v3 = vadd.f32 %v564_v1, %v563_v0  ;;  %v566_v4 = vpop.f32.mrb[6].mxu0 }
 0x2f1   :  { %v567_v5 = vpop.f32.mrb[7].mxu0 }
 0x2f2   :  { %v466_v6 = vadd.f32 %v565_v3, %v527_v2 }
 0x2f4   :  { %v474_v7 = vsel %vm473_vm2, %v466_v6, -inf }
 0x2f5   :  { %475 = vmax.xlane.f32.xlu0 %v474_v7 }
 0x382   :  { %v476_v8 = vpop.xlane.xlu0 %475 }
 0x383   :  { %v477_v9 = vsub.f32 %v474_v7, %v476_v8 }
 0x385   :  { %v478_v10 = vmul.f32 1.442695, %v477_v9 }
 0x387   :  { %637 = vpow2.f32 %v478_v10 }
 0x391   :  { %v638_v11 = vpop.eup %637 }
 0x392   :  { %480 = vadd.xlane.f32.xlu0 %v638_v11 }
 0x41f   :  { %v481_v12 = vpop.xlane.xlu0 %480 }
 0x420   :  { %639 = vrcp.f32 %v481_v12 }
 0x42a   :  { %v640_v13 = vpop.eup %639 }
 0x42b   :  { %v483_v14 = vmul.f32 %v640_v13, %v481_v12 }
 0x42d   :  { %v484_v15 = vsub.f32 2.0, %v483_v14 }
 0x42f   :  { %v485_v16 = vmul.f32 %v640_v13, %v484_v15 }
 0x431   :  { %v486_v17 = vmul.f32 %v638_v11, %v485_v16 }
 0x433   :  { %v487_v18 = vsel %vm473_vm2, %v486_v17, %v466_v6 }
 0x434   :  { %488 = vst [vmem:[#allocation10] sm:$0xff] %v487_v18 }
 0x435   :  { %740 = shalt.err (!%p737_p8)
}
 0x436   :  { %s741_s25 = scalar_lea.hbm %s883_s5, 128 }
 0x437   :  { %p742_p9 = scmp.ne.s32.totalorder %s883_s5, %s741_s25  ;;  %p745_p10 = scmp.lt.u32.totalorder %s741_s25, %s883_s5 }
 0x439   :  { %p747_p11 = pnand %p745_p10, %p742_p9 }
 0x43b   :  { %750 = shalt.err (!%p747_p11)
}
 0x43c   :  { %498 = dma.vmem_to_hbm [thread:$0]  %s496_s21, 128, %s883_s5, [#allocation4]  }
 0x43d   :  { %757 = dma.done.wait [#allocation4], 128  }
 0x43e   :  { %758 = vsyncadd [#allocation4], 4294967168 }
 0x43f   :  { %502 = vsyncpa [#allocation3], 1 }
 0x440   :  { %503 = vsyncpa [#allocation6], 1 }
 0x441   :  { %504 = vsyncpa [#allocation9], 1 }
 0x442   :  { %505 = vsyncpa [#allocation4], 1 }

</bundles_post_ra>
